<compile_context>
chip_gen: v7x
topology: tpu7x:2x2x1
jax: 0.10.0
libtpu: 0.0.40
codegen_flags: <defaults>
</compile_context>

<pallas_src>
import functools
import math

import jax
import jax.numpy as jnp
from jax.experimental import pallas as pl
from jax.experimental.pallas import tpu as pltpu

NEG_SLOPE = 0.2  # nn.LeakyReLU(0.2)


def _leaky(x):
    return jnp.where(x > 0, x, NEG_SLOPE * x)


def resblk_kernel(x_ref, w1_ref, b1_ref, w2_ref, b2_ref, wsc_ref, o_ref,
                  a_sc, y1_sc, *, H, W, Cin, Cout):
    """One batch element per grid step; activations kept in (rows, W*C) layout.

    x_ref  : (1, H, W*Cin)        f32  raw input, (w, c) flattened on lanes
    w1_ref : (3, W*Cin, W*Cout)   bf16 conv1 block-banded weights (one per dy)
    b1_ref : (1, W*Cout)          f32  conv1 bias tiled W times
    w2_ref : (3, W*Cout, W*Cout)  bf16 conv2 block-banded weights * 1/sqrt(2)
    b2_ref : (1, W*Cout)          f32  conv2 bias tiled W times * 1/sqrt(2)
    wsc_ref: (W*Cin, W*Cout)      f32  1x1 shortcut block-diag * 1/sqrt(2)
    o_ref  : (1, H, W*Cout)       f32  lane-dense output
    a_sc   : VMEM (H+2, W*Cin)  bf16  leaky(x) with zero row halo (dy taps)
    y1_sc  : VMEM (H+2, W*Cout) bf16  leaky(conv1 out) with zero row halo
    """
    f32 = jnp.float32
    bf16 = jnp.bfloat16

    x = x_ref[0]                                          # (H, W*Cin) f32

    # Vertical SAME padding = two zero halo rows (leaky(0) == 0 keeps them
    # valid after activation).  Horizontal SAME padding is already folded
    # into the banded weight matrices, so no horizontal halo or im2col
    # buffers are needed.  Halo rows are re-zeroed every step so the kernel
    # stays correct when the parallel batch axis is split across cores.
    a_sc[0:1, :] = jnp.zeros((1, W * Cin), bf16)
    a_sc[H + 1:H + 2, :] = jnp.zeros((1, W * Cin), bf16)
    a_sc[1:H + 1, :] = _leaky(x).astype(bf16)

    # conv1: three banded matmuls (one per dy row tap), f32 accumulation.
    acc1 = (jnp.dot(a_sc[0:H, :],     w1_ref[0], preferred_element_type=f32)
            + jnp.dot(a_sc[1:H + 1, :], w1_ref[1], preferred_element_type=f32)
            + jnp.dot(a_sc[2:H + 2, :], w1_ref[2], preferred_element_type=f32)
            + b1_ref[...])                                 # (H, W*Cout)

    # Activation straight into conv2's halo scratch, same layout: one dense
    # store, no relayout between the two convolutions.
    y1_sc[0:1, :] = jnp.zeros((1, W * Cout), bf16)
    y1_sc[H + 1:H + 2, :] = jnp.zeros((1, W * Cout), bf16)
    y1_sc[1:H + 1, :] = _leaky(acc1).astype(bf16)

    # conv2 (1/sqrt(2) pre-folded into the weights and bias).
    acc2 = (jnp.dot(y1_sc[0:H, :],     w2_ref[0], preferred_element_type=f32)
            + jnp.dot(y1_sc[1:H + 1, :], w2_ref[1], preferred_element_type=f32)
            + jnp.dot(y1_sc[2:H + 2, :], w2_ref[2], preferred_element_type=f32)
            + b2_ref[...])                                 # (H, W*Cout)

    # Learned 1x1 shortcut on the raw (unactivated) x, kept in f32 for parity.
    sc = jnp.dot(x, wsc_ref[...], preferred_element_type=f32)

    o_ref[0] = sc + acc2                                   # lane-dense store


# ---------------- wrapper-side weight preparation ----------------

def _banded_conv3x3_weights(w_hwio, W):
    """HWIO (3,3,Ci,Co) -> (3, W*Ci, W*Co).

    For each dy, builds the block-banded matrix that applies all three dx
    taps (and horizontal SAME zero padding, by dropping out-of-range blocks)
    as a single lane-dense matmul on a (rows, W*Ci) activation layout:
      big_dy[wi*Ci+ci, wo*Co+co] = w[dy, dx, ci, co]  where wi = wo + dx - 1.
    """
    kh, kw, Ci, Co = w_hwio.shape
    slabs = []
    for dy in range(kh):
        big = jnp.zeros((W * Ci, W * Co), w_hwio.dtype)
        for dx in range(kw):
            big = big + jnp.kron(jnp.eye(W, k=1 - dx, dtype=w_hwio.dtype),
                                 w_hwio[dy, dx])
        slabs.append(big)
    return jnp.stack(slabs)                              # (3, W*Ci, W*Co)


def _blockdiag_1x1_weights(w_io, W):
    """(Ci, Co) -> block-diagonal (W*Ci, W*Co) for the 1x1 shortcut."""
    return jnp.kron(jnp.eye(W, dtype=w_io.dtype), w_io)


def _vmem_limit_bytes(H, W, Cin, Cout):
    """Budget from the actual per-step footprint, asserted against the
    smallest per-generation VMEM (v7x: 64 MiB; v5e/v6e have 128 MiB)."""
    f32b, bf16b = 4, 2
    io_blocks = H * W * Cin * f32b + H * W * Cout * f32b
    weights = (3 * (W * Cin) * (W * Cout) * bf16b
               + 3 * (W * Cout) * (W * Cout) * bf16b
               + (W * Cin) * (W * Cout) * f32b
               + 2 * (W * Cout) * f32b)
    scratch = (H + 2) * W * Cin * bf16b + (H + 2) * W * Cout * bf16b
    # double-buffered I/O + (conservatively) double-buffered weights,
    # 2x headroom for (8,128)/(16,128) layout padding and compiler temps.
    need = 2 * (2 * io_blocks + 2 * weights + scratch)
    ceiling = 64 << 20
    if need > ceiling:
        raise ValueError(
            f"ResBlk per-step footprint ~{need} B exceeds the {ceiling} B "
            "VMEM ceiling; row-tile H for this shape.")
    return max(need, 4 << 20)


def resblk_pallas(x_nhwc, w1, b1, w2, b2, wsc_1x1):
    """x_nhwc: (N,H,W,Cin) f32; conv weights HWIO f32; returns (N,H,W,Cout)."""
    N, H, W, Cin = x_nhwc.shape
    Cout = w1.shape[-1]
    inv_sqrt2 = 1.0 / math.sqrt(2.0)

    # Free, contiguity-preserving reshape to the lane-dense (rows, W*C) layout.
    x2d = x_nhwc.reshape(N, H, W * Cin)

    w1_band = _banded_conv3x3_weights(w1, W).astype(jnp.bfloat16)
    w2_band = (_banded_conv3x3_weights(w2, W) * inv_sqrt2).astype(jnp.bfloat16)
    wsc_diag = (_blockdiag_1x1_weights(wsc_1x1[0, 0], W)
                * inv_sqrt2).astype(jnp.float32)          # f32 shortcut path
    b1_row = jnp.tile(b1.astype(jnp.float32), W).reshape(1, W * Cout)
    b2_row = (jnp.tile(b2.astype(jnp.float32), W)
              * inv_sqrt2).reshape(1, W * Cout)

    kernel = functools.partial(resblk_kernel, H=H, W=W, Cin=Cin, Cout=Cout)
    out2d = pl.pallas_call(
        kernel,
        out_shape=jax.ShapeDtypeStruct((N, H, W * Cout), jnp.float32),
        grid_spec=pltpu.PrefetchScalarGridSpec(
            num_scalar_prefetch=0,
            grid=(N,),  # N>=2 grid steps so both v7x TensorCores get work
            in_specs=[
                pl.BlockSpec((1, H, W * Cin), lambda n: (n, 0, 0)),
                pl.BlockSpec((3, W * Cin, W * Cout), lambda n: (0, 0, 0)),
                pl.BlockSpec((1, W * Cout), lambda n: (0, 0)),
                pl.BlockSpec((3, W * Cout, W * Cout), lambda n: (0, 0, 0)),
                pl.BlockSpec((1, W * Cout), lambda n: (0, 0)),
                pl.BlockSpec((W * Cin, W * Cout), lambda n: (0, 0)),
            ],
            out_specs=pl.BlockSpec((1, H, W * Cout), lambda n: (n, 0, 0)),
            scratch_shapes=[
                pltpu.VMEM((H + 2, W * Cin), jnp.bfloat16),
                pltpu.VMEM((H + 2, W * Cout), jnp.bfloat16),
            ],
        ),
        compiler_params=pltpu.CompilerParams(
            dimension_semantics=("parallel",),
            vmem_limit_bytes=_vmem_limit_bytes(H, W, Cin, Cout),
        ),
    )(x2d, w1_band, b1_row, w2_band, b2_row, wsc_diag)
    return out2d.reshape(N, H, W, Cout)


# ---------------- parameter setup (plain-JAX glue) ----------------

def spectral_normalize(w_hwio):
    """Divide conv weight by its exact spectral norm (the limit of PyTorch's
    power-iteration estimate in nn.utils.spectral_norm)."""
    o = w_hwio.shape[-1]
    mat = jnp.transpose(w_hwio, (3, 2, 0, 1)).reshape(o, -1)  # (O, I*kh*kw)
    sigma = jnp.linalg.norm(mat, ord=2)
    return w_hwio / sigma


# ---------------- pure-JAX reference for correctness ----------------

def resblk_ref(x, w1, b1, w2, b2, wsc_1x1):
    dn = ('NHWC', 'HWIO', 'NHWC')
    conv = lambda a, w, pad: jax.lax.conv_general_dilated(
        a, w, (1, 1), pad, dimension_numbers=dn)
    res = conv(_leaky(x), w1, 'SAME') + b1
    res = conv(_leaky(res), w2, 'SAME') + b2
    sc = conv(x, wsc_1x1, 'VALID')
    return (sc + res) / math.sqrt(2.0)


if __name__ == "__main__":
    key = jax.random.PRNGKey(0)
    N, Cin, Cout, H, W = 2, 4, 8, 16, 16   # dim_in=4, dim_out=8 -> learned_sc
    ks = jax.random.split(key, 6)

    x = jax.random.normal(ks[0], (N, H, W, Cin), jnp.float32)
    w1 = spectral_normalize(0.2 * jax.random.normal(ks[1], (3, 3, Cin, Cout), jnp.float32))
    b1 = 0.1 * jax.random.normal(ks[2], (Cout,), jnp.float32)
    w2 = spectral_normalize(0.2 * jax.random.normal(ks[3], (3, 3, Cout, Cout), jnp.float32))
    b2 = 0.1 * jax.random.normal(ks[4], (Cout,), jnp.float32)
    wsc = spectral_normalize(0.2 * jax.random.normal(ks[5], (1, 1, Cin, Cout), jnp.float32))

    out = resblk_pallas(x, w1, b1, w2, b2, wsc)
    jax.block_until_ready(out)

    ref = resblk_ref(x, w1, b1, w2, b2, wsc)
    assert out.shape == (N, H, W, Cout)
    # conv matmuls use bf16 operands (f32 accumulation); shortcut is f32.
    assert jnp.allclose(out, ref, atol=5e-2, rtol=5e-2), \
        f"max abs err {jnp.max(jnp.abs(out - ref))}"
    print("KERNEL_OK")
</pallas_src>

<mosaic_0001>
module attributes {stable_mosaic.version = 11 : i64} {
  func.func @resblk_kernel(%arg0: i32, %arg1: memref<1x16x64xf32, #tpu.memory_space<vmem>>, %arg2: memref<3x64x128xbf16, #tpu.memory_space<vmem>>, %arg3: memref<1x128xf32, #tpu.memory_space<vmem>>, %arg4: memref<3x128x128xbf16, #tpu.memory_space<vmem>>, %arg5: memref<1x128xf32, #tpu.memory_space<vmem>>, %arg6: memref<64x128xf32, #tpu.memory_space<vmem>>, %arg7: memref<1x16x128xf32, #tpu.memory_space<vmem>>, %arg8: memref<18x64xbf16, #tpu.memory_space<vmem>>, %arg9: memref<18x128xbf16, #tpu.memory_space<vmem>>) attributes {dimension_semantics = [#tpu.dimension_semantics<parallel>], iteration_bounds = array<i64: 2>, scalar_prefetch = 0 : i64, scratch_operands = 2 : i64, tpu.core_type = #tpu.core_type<tc>, window_params = [{transform_indices = @transform_0, window_bounds = array<i64: 1, 16, 64>}, {pipeline_mode = #tpu.pipeline_mode<synchronous>, transform_indices = @transform_1, window_bounds = array<i64: 3, 64, 128>}, {pipeline_mode = #tpu.pipeline_mode<synchronous>, transform_indices = @transform_2, window_bounds = array<i64: 1, 128>}, {pipeline_mode = #tpu.pipeline_mode<synchronous>, transform_indices = @transform_3, window_bounds = array<i64: 3, 128, 128>}, {pipeline_mode = #tpu.pipeline_mode<synchronous>, transform_indices = @transform_4, window_bounds = array<i64: 1, 128>}, {pipeline_mode = #tpu.pipeline_mode<synchronous>, transform_indices = @transform_5, window_bounds = array<i64: 64, 128>}, {transform_indices = @transform_6, window_bounds = array<i64: 1, 16, 128>}]} {
    %c0 = arith.constant 0 : index
    %c0_0 = arith.constant 0 : index
    %c0_1 = arith.constant 0 : index
    %0 = vector.load %arg1[%c0, %c0_0, %c0_1] : memref<1x16x64xf32, #tpu.memory_space<vmem>>, vector<1x16x64xf32>
    %1 = vector.shape_cast %0 : vector<1x16x64xf32> to vector<16x64xf32>
    %cst = arith.constant 0.000000e+00 : bf16
    %2 = vector.broadcast %cst : bf16 to vector<1x64xbf16>
    %c0_2 = arith.constant 0 : index
    %c0_3 = arith.constant 0 : index
    %3 = vector.load %arg8[%c0_2, %c0_3] : memref<18x64xbf16, #tpu.memory_space<vmem>>, vector<1x64xbf16>
    tpu.vector_store %arg8[%c0_2, %c0_3], %2 {strides = array<i32>} : memref<18x64xbf16, #tpu.memory_space<vmem>>, vector<1x64xbf16>,
    %cst_4 = arith.constant 0.000000e+00 : bf16
    %4 = vector.broadcast %cst_4 : bf16 to vector<1x64xbf16>
    %c17 = arith.constant 17 : index
    %c0_5 = arith.constant 0 : index
    %5 = vector.load %arg8[%c17, %c0_5] : memref<18x64xbf16, #tpu.memory_space<vmem>>, vector<1x64xbf16>
    tpu.vector_store %arg8[%c17, %c0_5], %4 {strides = array<i32>} : memref<18x64xbf16, #tpu.memory_space<vmem>>, vector<1x64xbf16>,
    %cst_6 = arith.constant 0.000000e+00 : f32
    %6 = vector.broadcast %cst_6 : f32 to vector<16x64xf32>
    %7 = arith.cmpf ogt, %1, %6 : vector<16x64xf32>
    %cst_7 = arith.constant 2.000000e-01 : f32
    %8 = vector.broadcast %cst_7 : f32 to vector<16x64xf32>
    %9 = arith.mulf %8, %1 : vector<16x64xf32>
    %10 = arith.select %7, %1, %9 : vector<16x64xi1>, vector<16x64xf32>
    %11 = arith.truncf %10 : vector<16x64xf32> to vector<16x64xbf16>
    %c1 = arith.constant 1 : index
    %c0_8 = arith.constant 0 : index
    %12 = vector.load %arg8[%c1, %c0_8] : memref<18x64xbf16, #tpu.memory_space<vmem>>, vector<16x64xbf16>
    tpu.vector_store %arg8[%c1, %c0_8], %11 {strides = array<i32>} : memref<18x64xbf16, #tpu.memory_space<vmem>>, vector<16x64xbf16>,
    %c0_9 = arith.constant 0 : index
    %c0_10 = arith.constant 0 : index
    %13 = vector.load %arg8[%c0_9, %c0_10] : memref<18x64xbf16, #tpu.memory_space<vmem>>, vector<16x64xbf16>
    %c0_11 = arith.constant 0 : index
    %c0_12 = arith.constant 0 : index
    %c0_13 = arith.constant 0 : index
    %14 = vector.load %arg2[%c0_11, %c0_12, %c0_13] : memref<3x64x128xbf16, #tpu.memory_space<vmem>>, vector<1x64x128xbf16>
    %15 = vector.shape_cast %14 : vector<1x64x128xbf16> to vector<64x128xbf16>
    %cst_14 = arith.constant dense<0.000000e+00> : vector<16x128xf32>
    %16 = tpu.matmul %13, %15, %cst_14 {dimension_numbers = #tpu.dot_dimension_numbers<[1], [0], [0], [1], [0, 0, 1, 1], [], []>} : vector<16x64xbf16>, vector<64x128xbf16>, vector<16x128xf32> -> vector<16x128xf32>
    %c1_15 = arith.constant 1 : index
    %c0_16 = arith.constant 0 : index
    %17 = vector.load %arg8[%c1_15, %c0_16] : memref<18x64xbf16, #tpu.memory_space<vmem>>, vector<16x64xbf16>
    %c1_17 = arith.constant 1 : index
    %c0_18 = arith.constant 0 : index
    %c0_19 = arith.constant 0 : index
    %18 = vector.load %arg2[%c1_17, %c0_18, %c0_19] : memref<3x64x128xbf16, #tpu.memory_space<vmem>>, vector<1x64x128xbf16>
    %19 = vector.shape_cast %18 : vector<1x64x128xbf16> to vector<64x128xbf16>
    %cst_20 = arith.constant dense<0.000000e+00> : vector<16x128xf32>
    %20 = tpu.matmul %17, %19, %cst_20 {dimension_numbers = #tpu.dot_dimension_numbers<[1], [0], [0], [1], [0, 0, 1, 1], [], []>} : vector<16x64xbf16>, vector<64x128xbf16>, vector<16x128xf32> -> vector<16x128xf32>
    %21 = arith.addf %16, %20 : vector<16x128xf32>
    %c2 = arith.constant 2 : index
    %c0_21 = arith.constant 0 : index
    %22 = vector.load %arg8[%c2, %c0_21] : memref<18x64xbf16, #tpu.memory_space<vmem>>, vector<16x64xbf16>
    %c2_22 = arith.constant 2 : index
    %c0_23 = arith.constant 0 : index
    %c0_24 = arith.constant 0 : index
    %23 = vector.load %arg2[%c2_22, %c0_23, %c0_24] : memref<3x64x128xbf16, #tpu.memory_space<vmem>>, vector<1x64x128xbf16>
    %24 = vector.shape_cast %23 : vector<1x64x128xbf16> to vector<64x128xbf16>
    %cst_25 = arith.constant dense<0.000000e+00> : vector<16x128xf32>
    %25 = tpu.matmul %22, %24, %cst_25 {dimension_numbers = #tpu.dot_dimension_numbers<[1], [0], [0], [1], [0, 0, 1, 1], [], []>} : vector<16x64xbf16>, vector<64x128xbf16>, vector<16x128xf32> -> vector<16x128xf32>
    %26 = arith.addf %21, %25 : vector<16x128xf32>
    %c0_26 = arith.constant 0 : index
    %c0_27 = arith.constant 0 : index
    %27 = vector.load %arg3[%c0_26, %c0_27] : memref<1x128xf32, #tpu.memory_space<vmem>>, vector<1x128xf32>
    %28 = vector.broadcast %27 : vector<1x128xf32> to vector<16x128xf32>
    %29 = arith.addf %26, %28 : vector<16x128xf32>
    %cst_28 = arith.constant 0.000000e+00 : bf16
    %30 = vector.broadcast %cst_28 : bf16 to vector<1x128xbf16>
    %c0_29 = arith.constant 0 : index
    %c0_30 = arith.constant 0 : index
    %31 = vector.load %arg9[%c0_29, %c0_30] : memref<18x128xbf16, #tpu.memory_space<vmem>>, vector<1x128xbf16>
    tpu.vector_store %arg9[%c0_29, %c0_30], %30 {strides = array<i32>} : memref<18x128xbf16, #tpu.memory_space<vmem>>, vector<1x128xbf16>,
    %cst_31 = arith.constant 0.000000e+00 : bf16
    %32 = vector.broadcast %cst_31 : bf16 to vector<1x128xbf16>
    %c17_32 = arith.constant 17 : index
    %c0_33 = arith.constant 0 : index
    %33 = vector.load %arg9[%c17_32, %c0_33] : memref<18x128xbf16, #tpu.memory_space<vmem>>, vector<1x128xbf16>
    tpu.vector_store %arg9[%c17_32, %c0_33], %32 {strides = array<i32>} : memref<18x128xbf16, #tpu.memory_space<vmem>>, vector<1x128xbf16>,
    %cst_34 = arith.constant 0.000000e+00 : f32
    %34 = vector.broadcast %cst_34 : f32 to vector<16x128xf32>
    %35 = arith.cmpf ogt, %29, %34 : vector<16x128xf32>
    %cst_35 = arith.constant 2.000000e-01 : f32
    %36 = vector.broadcast %cst_35 : f32 to vector<16x128xf32>
    %37 = arith.mulf %36, %29 : vector<16x128xf32>
    %38 = arith.select %35, %29, %37 : vector<16x128xi1>, vector<16x128xf32>
    %39 = arith.truncf %38 : vector<16x128xf32> to vector<16x128xbf16>
    %c1_36 = arith.constant 1 : index
    %c0_37 = arith.constant 0 : index
    %40 = vector.load %arg9[%c1_36, %c0_37] : memref<18x128xbf16, #tpu.memory_space<vmem>>, vector<16x128xbf16>
    tpu.vector_store %arg9[%c1_36, %c0_37], %39 {strides = array<i32>} : memref<18x128xbf16, #tpu.memory_space<vmem>>, vector<16x128xbf16>,
    %c0_38 = arith.constant 0 : index
    %c0_39 = arith.constant 0 : index
    %41 = vector.load %arg9[%c0_38, %c0_39] : memref<18x128xbf16, #tpu.memory_space<vmem>>, vector<16x128xbf16>
    %c0_40 = arith.constant 0 : index
    %c0_41 = arith.constant 0 : index
    %c0_42 = arith.constant 0 : index
    %42 = vector.load %arg4[%c0_40, %c0_41, %c0_42] : memref<3x128x128xbf16, #tpu.memory_space<vmem>>, vector<1x128x128xbf16>
    %43 = vector.shape_cast %42 : vector<1x128x128xbf16> to vector<128x128xbf16>
    %cst_43 = arith.constant dense<0.000000e+00> : vector<16x128xf32>
    %44 = tpu.matmul %41, %43, %cst_43 {dimension_numbers = #tpu.dot_dimension_numbers<[1], [0], [0], [1], [0, 0, 1, 1], [], []>} : vector<16x128xbf16>, vector<128x128xbf16>, vector<16x128xf32> -> vector<16x128xf32>
    %c1_44 = arith.constant 1 : index
    %c0_45 = arith.constant 0 : index
    %45 = vector.load %arg9[%c1_44, %c0_45] : memref<18x128xbf16, #tpu.memory_space<vmem>>, vector<16x128xbf16>
    %c1_46 = arith.constant 1 : index
    %c0_47 = arith.constant 0 : index
    %c0_48 = arith.constant 0 : index
    %46 = vector.load %arg4[%c1_46, %c0_47, %c0_48] : memref<3x128x128xbf16, #tpu.memory_space<vmem>>, vector<1x128x128xbf16>
    %47 = vector.shape_cast %46 : vector<1x128x128xbf16> to vector<128x128xbf16>
    %cst_49 = arith.constant dense<0.000000e+00> : vector<16x128xf32>
    %48 = tpu.matmul %45, %47, %cst_49 {dimension_numbers = #tpu.dot_dimension_numbers<[1], [0], [0], [1], [0, 0, 1, 1], [], []>} : vector<16x128xbf16>, vector<128x128xbf16>, vector<16x128xf32> -> vector<16x128xf32>
    %49 = arith.addf %44, %48 : vector<16x128xf32>
    %c2_50 = arith.constant 2 : index
    %c0_51 = arith.constant 0 : index
    %50 = vector.load %arg9[%c2_50, %c0_51] : memref<18x128xbf16, #tpu.memory_space<vmem>>, vector<16x128xbf16>
    %c2_52 = arith.constant 2 : index
    %c0_53 = arith.constant 0 : index
    %c0_54 = arith.constant 0 : index
    %51 = vector.load %arg4[%c2_52, %c0_53, %c0_54] : memref<3x128x128xbf16, #tpu.memory_space<vmem>>, vector<1x128x128xbf16>
    %52 = vector.shape_cast %51 : vector<1x128x128xbf16> to vector<128x128xbf16>
    %cst_55 = arith.constant dense<0.000000e+00> : vector<16x128xf32>
    %53 = tpu.matmul %50, %52, %cst_55 {dimension_numbers = #tpu.dot_dimension_numbers<[1], [0], [0], [1], [0, 0, 1, 1], [], []>} : vector<16x128xbf16>, vector<128x128xbf16>, vector<16x128xf32> -> vector<16x128xf32>
    %54 = arith.addf %49, %53 : vector<16x128xf32>
    %c0_56 = arith.constant 0 : index
    %c0_57 = arith.constant 0 : index
    %55 = vector.load %arg5[%c0_56, %c0_57] : memref<1x128xf32, #tpu.memory_space<vmem>>, vector<1x128xf32>
    %56 = vector.broadcast %55 : vector<1x128xf32> to vector<16x128xf32>
    %57 = arith.addf %54, %56 : vector<16x128xf32>
    %c0_58 = arith.constant 0 : index
    %c0_59 = arith.constant 0 : index
    %58 = vector.load %arg6[%c0_58, %c0_59] : memref<64x128xf32, #tpu.memory_space<vmem>>, vector<64x128xf32>
    %cst_60 = arith.constant dense<0.000000e+00> : vector<16x128xf32>
    %59 = tpu.matmul %1, %58, %cst_60 {dimension_numbers = #tpu.dot_dimension_numbers<[1], [0], [0], [1], [0, 0, 1, 1], [], []>} : vector<16x64xf32>, vector<64x128xf32>, vector<16x128xf32> -> vector<16x128xf32>
    %60 = arith.addf %59, %57 : vector<16x128xf32>
    %c0_61 = arith.constant 0 : index
    %c0_62 = arith.constant 0 : index
    %c0_63 = arith.constant 0 : index
    %61 = vector.load %arg7[%c0_61, %c0_62, %c0_63] : memref<1x16x128xf32, #tpu.memory_space<vmem>>, vector<1x16x128xf32>
    %62 = vector.shape_cast %61 : vector<1x16x128xf32> to vector<16x128xf32>
    %63 = vector.shape_cast %60 : vector<16x128xf32> to vector<1x16x128xf32>
    tpu.vector_store %arg7[%c0_61, %c0_62, %c0_63], %63 {strides = array<i32>} : memref<1x16x128xf32, #tpu.memory_space<vmem>>, vector<1x16x128xf32>,
    return
  }
  func.func @transform_0(%arg0: i32) -> (i32, i32, i32) {
    %c0_i32 = arith.constant 0 : i32
    %c0_i32_0 = arith.constant 0 : i32
    %c0_i32_1 = arith.constant 0 : i32
    return %arg0, %c0_i32, %c0_i32_0 : i32, i32, i32
  }
  func.func @transform_1(%arg0: i32) -> (i32, i32, i32) {
    %c0_i32 = arith.constant 0 : i32
    %c0_i32_0 = arith.constant 0 : i32
    %c0_i32_1 = arith.constant 0 : i32
    %c0_i32_2 = arith.constant 0 : i32
    return %c0_i32, %c0_i32_0, %c0_i32_1 : i32, i32, i32
  }
  func.func @transform_2(%arg0: i32) -> (i32, i32) {
    %c0_i32 = arith.constant 0 : i32
    %c0_i32_0 = arith.constant 0 : i32
    %c0_i32_1 = arith.constant 0 : i32
    return %c0_i32, %c0_i32_0 : i32, i32
  }
  func.func @transform_3(%arg0: i32) -> (i32, i32, i32) {
    %c0_i32 = arith.constant 0 : i32
    %c0_i32_0 = arith.constant 0 : i32
    %c0_i32_1 = arith.constant 0 : i32
    %c0_i32_2 = arith.constant 0 : i32
    return %c0_i32, %c0_i32_0, %c0_i32_1 : i32, i32, i32
  }
  func.func @transform_4(%arg0: i32) -> (i32, i32) {
    %c0_i32 = arith.constant 0 : i32
    %c0_i32_0 = arith.constant 0 : i32
    %c0_i32_1 = arith.constant 0 : i32
    return %c0_i32, %c0_i32_0 : i32, i32
  }
  func.func @transform_5(%arg0: i32) -> (i32, i32) {
    %c0_i32 = arith.constant 0 : i32
    %c0_i32_0 = arith.constant 0 : i32
    %c0_i32_1 = arith.constant 0 : i32
    return %c0_i32, %c0_i32_0 : i32, i32
  }
  func.func @transform_6(%arg0: i32) -> (i32, i32, i32) {
    %c0_i32 = arith.constant 0 : i32
    %c0_i32_0 = arith.constant 0 : i32
    %c0_i32_1 = arith.constant 0 : i32
    return %arg0, %c0_i32, %c0_i32_0 : i32, i32, i32
  }
}

</mosaic_0001>

<bundles_post_ra>
// kernel: tpu_custom_call.1
= control target key start
LH: loop header
LB: loop body
LE: loop exit
PB: predicated region body
PF: predicated region fallthrough
CT: control target
= control target key end

     0   :  { %11 = vsyncpa [#allocation5], 0  ;;  %s2278_s0 = inlined_call_operand.hbm [shape: f32[2,16,64], index: 0, kind: input, shape index: {}]   ;;  %s2279_s1 = inlined_call_operand.hbm [shape: bf16[3,64,128], index: 1, kind: input, shape index: {}]   ;;  %s2280_s2 = inlined_call_operand.vmem [shape: f32[1,128], index: 2, kind: input, shape index: {}]   ;;  %s2281_s3 = inlined_call_operand.hbm [shape: bf16[3,128,128], index: 3, kind: input, shape index: {}]   ;;  %s2282_s4 = inlined_call_operand.vmem [shape: f32[1,128], index: 4, kind: input, shape index: {}]   ;;  %s2283_s5 = inlined_call_operand.hbm [shape: f32[64,128], index: 5, kind: input, shape index: {}]   ;;  %s2284_s6 = inlined_call_operand.hbm [shape: f32[2,16,128], index: 6, kind: output, shape index: {}]  }
   0x1   :  { %13 = vsyncpa [#allocation5 + $0x1], 0 }
   0x2   :  { %14 = vsyncpa [#allocation8], 0 }
   0x3   :  { %15 = vsyncpa [#allocation11], 0 }
   0x4   :  { %16 = vsyncpa [#allocation6], 0 }
   0x5   :  { %18 = vsyncpa [#allocation6 + $0x1], 0  ;;  %s1890_s21 = smov 0   ;;  %s1892_s22 = smov 0  }
   0x6   :  { %s1894_s23 = smov 0   ;;  %s1896_s24 = smov 0  }
   0x7 LB: > { %s1911_s25 = sadd.s32 4294967295, %s1840_s24   ;;  %s1263_s26 = sadd.s32 4294967294, %s1840_s24   ;;  %s1840_s24 = sphi %s1896_s24, %s2315_s24   ;;  %s1836_s23 = sphi %s1894_s23, %s2314_s23   ;;  %s1832_s22 = sphi %s1892_s22, %s2313_s22   ;;  %s1828_s21 = sphi %s1890_s21, %s2312_s21  }
   0x8   : > { %p44_p0 = scmp.ne.s32.totalorder %s1832_s22, %s1828_s21  ;;  %p2285_p1 = scmp.eq.s32.totalorder %s1911_s25, 0 }
   0x9   : > { %p179_p3 = scmp.eq.s32.totalorder %s1263_s26, 1  ;;  %p1264_p5 = scmp.ge.s32.totalorder %s1840_s24, 1 }
   0xa   : > { %p1920_p4 = por %p2285_p1, %p44_p0  ;;  %p186_p7 = scmp.lt.s32.totalorder %s1840_s24, 3 }
   0xb   : > { %p1925_p6 = por %p179_p3, %p44_p0  ;;  %s1842_s30 = smov [#allocation7]  }
   0xc   : > { %s2288_s27 = scalar_select %p1920_p4, 1, 0 }
   0xd   : > { %s2289_s28 = scalar_select %p1925_p6, 1, 0 }
   0xe   : > { %p1930_p8 = pnand %p1264_p5, %p186_p7  ;;  %s198_s7 = sshll.u32 %s1842_s30, 4  ;;  %s1934_s7 = int_to_ptr.vmem [resolvable:$true] %s198_s7 }
   0xf   : > { %s1843_s9 = smov [#allocation9]   ;;  %s1844_s11 = smov [#allocation10]  }
  0x10   : > { %s2290_s29 = scalar_select %p1930_p8, 1, 0 }
  0x11   : > { %p1541_p9 = pneg %p1930_p8  ;;  %s214_s10 = sshll.u32 %s1843_s9, 4  ;;  %s1945_s10 = int_to_ptr.vmem [resolvable:$true] %s214_s10 }
  0x12   : > { %s1947_s12 = sshll.u32 %s1844_s11, 4  ;;  %s1652_s15 = scalar_lea.hbm %s2279_s1, 1536  ;;  %s231_s12 = int_to_ptr.vmem [resolvable:$true] %s1947_s12 }
  0x13   : > { %p1941_p11 = pnand %p1541_p9, %p2285_p1  ;;  %p1653_p12 = scmp.ne.s32.totalorder %s2279_s1, %s1652_s15 }
  0x14   : > { %p1659_p5 = scmp.lt.u32.totalorder %s1652_s15, %s2279_s1 }
  0x15   : > { %p1957_p13 = pneg %p1941_p11 }
  0x17   : > { %p1655_p0 = pnand %p1957_p13, %p1653_p12 }
  0x19   : > { %p1656_p3 = pneg %p1655_p0 }
  0x1b   : > { %p1661_p7 = pnand %p1659_p5, %p1656_p3 }
  0x1d   : > { %1664 = shalt.err (!%p1661_p7)
}
  0x1e   : > { %s1665_s26 = scalar_lea.vmem %s1934_s7, 1536  ;;  %p1673_p2 = scmp.lt.s32.totalorder %s1934_s7, %s1934_s7 }
  0x1f   : > { %p1666_p9 = scmp.ne.s32.totalorder %s1934_s7, %s1665_s26  ;;  %p1674_p6 = scmp.lt.s32.totalorder %s1665_s26, %s1665_s26 }
  0x21   : > { %p1668_p10 = pnand %p1666_p9, %p1957_p13  ;;  %p1675_p12 = por %p1674_p6, %p1673_p2 }
  0x23   : > { %p1669_p1 = pneg %p1668_p10 }
  0x25   : > { %p1676_p0 = pnand %p1675_p12, %p1669_p1 }
  0x27   : > { %1679 = shalt.err (!%p1676_p0)
}
  0x28   : > { %s1845_s30 = smov 64   ;;  %s1846_s9 = smov 4  }
  0x29   : > { %1544 = dma.hbm_to_vmem [thread:$0]  (!%p1941_p11), %s2279_s1, 1536, %s1934_s7, [#allocation8], %s1845_s30, %s1845_s30, %s1846_s9  }
  0x2a   : > { %s1680_s16 = scalar_lea.hbm %s2281_s3, 3072 }
  0x2b   : > { %p1681_p2 = scmp.ne.s32.totalorder %s2281_s3, %s1680_s16  ;;  %p1687_p10 = scmp.lt.u32.totalorder %s1680_s16, %s2281_s3 }
  0x2d   : > { %p1683_p1 = pnand %p1681_p2, %p1957_p13 }
  0x2f   : > { %p1684_p6 = pneg %p1683_p1 }
  0x31   : > { %p1689_p3 = pnand %p1687_p10, %p1684_p6 }
  0x33   : > { %1692 = shalt.err (!%p1689_p3)
}
  0x34   : > { %s1693_s7 = scalar_lea.vmem %s1945_s10, 3072  ;;  %p1701_p12 = scmp.lt.s32.totalorder %s1945_s10, %s1945_s10 }
  0x35   : > { %p1694_p5 = scmp.ne.s32.totalorder %s1945_s10, %s1693_s7  ;;  %p1702_p0 = scmp.lt.s32.totalorder %s1693_s7, %s1693_s7 }
  0x37   : > { %p1696_p7 = pnand %p1694_p5, %p1957_p13  ;;  %p1703_p2 = por %p1702_p0, %p1701_p12 }
  0x39   : > { %p1697_p9 = pneg %p1696_p7 }
  0x3b   : > { %p1704_p1 = pnand %p1703_p2, %p1697_p9 }
  0x3d   : > { %1707 = shalt.err (!%p1704_p1)
}
  0x3e   : > { %1547 = dma.hbm_to_vmem [thread:$0]  (!%p1941_p11), %s2281_s3, 3072, %s1945_s10, [#allocation8], %s1845_s30, %s1845_s30, %s1846_s9  }
  0x3f   : > { %s1708_s16 = scalar_lea.hbm %s2283_s5, 1024 }
  0x40   : > { %p1709_p6 = scmp.ne.s32.totalorder %s2283_s5, %s1708_s16  ;;  %p1715_p5 = scmp.lt.u32.totalorder %s1708_s16, %s2283_s5 }
  0x42   : > { %p1711_p10 = pnand %p1709_p6, %p1957_p13 }
  0x44   : > { %p1712_p3 = pneg %p1711_p10 }
  0x46   : > { %p1717_p7 = pnand %p1715_p5, %p1712_p3 }
  0x48   : > { %1720 = shalt.err (!%p1717_p7)
}
  0x49   : > { %s1721_s7 = scalar_lea.vmem %s231_s12, 1024  ;;  %p1729_p2 = scmp.lt.s32.totalorder %s231_s12, %s231_s12 }
  0x4a   : > { %p1722_p9 = scmp.ne.s32.totalorder %s231_s12, %s1721_s7  ;;  %p1730_p1 = scmp.lt.s32.totalorder %s1721_s7, %s1721_s7 }
  0x4c   : > { %p1724_p12 = pnand %p1722_p9, %p1957_p13  ;;  %p1731_p4 = por %p1730_p1, %p1729_p2 }
  0x4e   : > { %p1725_p0 = pneg %p1724_p12 }
  0x50   : > { %p1732_p8 = pnand %p1731_p4, %p1725_p0 }
  0x52   : > { %1735 = shalt.err (!%p1732_p8)
}
  0x53   : > { %s1847_s10 = smov 128   ;;  %s1848_s18 = smov 8  }
  0x54   : > { %1550 = dma.hbm_to_vmem [thread:$0]  (!%p1941_p11), %s2283_s5, 1024, %s231_s12, [#allocation11], %s1847_s10, %s1847_s10, %s1848_s18  }
  0x55   : > { %s2024_s11 = sadd.s32 1, %s1840_s24   ;;  %s31_s14 = sadd.s32 1, %s1836_s23 }
  0x56   : > { %s28_s13 = ssub.s32 %s1840_s24, %s2024_s11  ;;  %p38_p8 = scmp.ne.s32.totalorder %s1836_s23, %s1832_s22 }
  0x57   : > { %p29_p4 = scmp.eq.s32.totalorder %s28_s13, 0  ;;  %p39_p13 = scmp.eq.s32.totalorder %s1840_s24, 0 }
  0x58   : > { %p1562_p6 = scmp.lt.s32.totalorder %s1840_s24, 2  ;;  %p2293_p3 = scmp.eq.s32.totalorder %s1911_s25, 1 }
  0x59   : > { %s2034_s15 = scalar_select %p29_p4, %s1836_s23, %s31_s14  }
  0x5a   : > { %p40_p10 = por %p39_p13, %p38_p8  ;;  %p2038_p5 = por %p2293_p3, %p38_p8 }
  0x5b   : > { %s244_s16 = sand.u32 1, %s1836_s23   ;;  %s1336_s17 = sshll.u32 %s1840_s24, 8 }
  0x5c   : > { %s1269_s12 = sshll.u32 %s244_s16, 4  ;;  %s2047_s26 = scalar_lea.hbm %s2278_s0, %s1336_s17 }
  0x5d   : > { %s248_s7 = scalar_lea.vmem [#allocation4], %s1269_s12  ;;  %p2049_p11 = pnand %p1562_p6, %p40_p10 }
  0x5e   : > { %s255_s30 = sshll.u32 %s248_s7, 4  ;;  %s2055_s13 = scalar_lea.sflag [#allocation5], %s244_s16  ;;  %s2053_s30 = int_to_ptr.vmem [resolvable:$true] %s255_s30 }
  0x5f   : > { %s1736_s14 = scalar_lea.hbm %s2047_s26, 256  ;;  %p1738_p9 = pneg %p2049_p11 }
  0x60   : > { %p1737_p7 = scmp.ne.s32.totalorder %s2047_s26, %s1736_s14  ;;  %s1741_s19 = scalar_lea.hbm %s2278_s0, 512 }
  0x61   : > { %p1742_p2 = scmp.lt.u32.totalorder %s2047_s26, %s2278_s0  ;;  %p1743_p1 = scmp.lt.u32.totalorder %s1741_s19, %s1736_s14 }
  0x62   : > { %p1739_p12 = pnand %p1738_p9, %p1737_p7  ;;  %p1745_p8 = scmp.lt.u32.totalorder %s1736_s14, %s2047_s26 }
  0x63   : > { %p1744_p4 = por %p1743_p1, %p1742_p2 }
  0x64   : > { %p1740_p0 = pneg %p1739_p12 }
  0x65   : > { %p1746_p13 = por %p1745_p8, %p1744_p4 }
  0x67   : > { %p1747_p6 = pnand %p1746_p13, %p1740_p0 }
  0x69   : > { %1750 = shalt.err (!%p1747_p6)
}
  0x6a   : > { %s1751_s16 = scalar_lea.vmem %s2053_s30, 256  ;;  %s1849_s17 = smov [#allocation4]  }
  0x6b   : > { %p1752_p10 = scmp.ne.s32.totalorder %s2053_s30, %s1751_s16  ;;  %s1756_s12 = sshll.u32 %s1849_s17, 4  ;;  %s1757_s12 = int_to_ptr.vmem [resolvable:$false] %s1756_s12 }
  0x6c   : > { %s1758_s20 = scalar_lea.vmem %s1757_s12, 512  ;;  %p1759_p12 = scmp.lt.s32.totalorder %s2053_s30, %s1757_s12 }
  0x6d   : > { %p1754_p3 = pnand %p1752_p10, %p1738_p9  ;;  %p1760_p2 = scmp.lt.s32.totalorder %s1758_s20, %s1751_s16 }
  0x6f   : > { %p1755_p7 = pneg %p1754_p3  ;;  %p1761_p1 = por %p1760_p2, %p1759_p12 }
  0x71   : > { %p1762_p4 = pnand %p1761_p1, %p1755_p7 }
  0x73   : > { %1765 = shalt.err (!%p1762_p4)
}
  0x74   : > { %1554 = dma.hbm_to_vmem [thread:$0]  (!%p2049_p11), %s2047_s26, 256, %s2053_s30, %s2055_s13, %s1847_s10, %s1847_s10, %s1848_s18  }
  0x75   : > { %p2296_p9 = scmp.ne.s32.totalorder %s2290_s29, 0 }
  0x76   : > { %s2089_s14 = sand.u32 (!%p2296_p9), 1, %s1832_s22   ;;  %p2297_p0 = scmp.ne.s32.totalorder (!%p2296_p9), %s2288_s27, 0 }
  0x77   : > { %267 = sbr.rel (%p2296_p9) target bundleno = 700 (0x2bc), region = 44  ;;  %s1273_s19 = sshll.u32 (!%p2296_p9), %s2089_s14, 4 }
  0x78   : > { %s270_s7 = scalar_lea.sflag (!%p2296_p9), [#allocation5], %s2089_s14  ;;  %s2095_s9 = scalar_lea.vmem (!%p2296_p9), [#allocation4], %s1273_s19 }
  0x7e   : > { %1811 = dma.done.wait (%p2297_p0), %s270_s7, 256  }
  0x7f   : > { %1813 = vsyncadd (%p2297_p0), %s270_s7, 4294967040  ;;  %p2298_p11 = scmp.eq.s32.totalorder %s1911_s25, 0 }
  0x81   : > { %1815 = dma.done.wait (%p2298_p11), [#allocation8], 4608   ;;  %p2299_p8 = pmov %p2298_p11 }
  0x83   : > { %1817 = vsyncadd (%p2299_p8), [#allocation8], 4294962688  ;;  %p2300_p13 = pmov %p2299_p8 }
  0x84   : > { %p2301_p6 = pmov %p2299_p8 }
  0x85   : > { %1819 = dma.done.wait (%p2300_p13), [#allocation11], 1024  }
  0x86   : > { %1821 = vsyncadd (%p2301_p6), [#allocation11], 4294966272  ;;  %v1850_v0 = vmov 0.0   ;;  %vm1851_vm0 = vmmov 0   ;;  %vm318_vm1 = vsmask.f32 256 }
  0x87   : > { %1394 = vmatprep.subr.bf16.mxu0 %v1850_v0  ;;  %1406 = vmatprep.subr.bf16.mxu1 %v1850_v0  ;;  %vm323_vm2 = vsmask.f32 7938  ;;  %v1610_v1 = vld [vmem:[#allocation7 + $0x20] sm:$0xff]   ;;  %vm317_vm3 = vcmask 516096   ;;  %v1612_v3 = vld [vmem:[#allocation7 + $0x28] sm:$0xff]   ;;  %v1614_v7 = vld [vmem:[#allocation7 + $0x30] sm:$0xff]  }
  0x88   : > { %1402 = vmatprep.mubr.msk.bf16.mxu0 %vm1851_vm0, %v1850_v0  ;;  %1414 = vmatprep.mubr.msk.bf16.mxu1 %vm1851_vm0, %v1850_v0  ;;  %v1611_v2 = vld [vmem:[#allocation7] sm:$0xff]   ;;  %v1613_v4 = vld [vmem:[#allocation7 + $0x8] sm:$0xff]   ;;  %vm2118_vm4 = vmand %vm317_vm3, %vm318_vm1  ;;  %vm340_vm6 = vsmask.f32 4368  ;;  %vm362_vm9 = vcmask 519168   ;;  %vm437_vm12 = vcmask 523264  }
  0x89   : > { %1395 = vmatpush3.bf16.msra.mxu0 %v1610_v1  ;;  %1407 = vmatpush3.bf16.msra.mxu1 %v1611_v2  ;;  %vm2123_vm5 = vmand %vm317_vm3, %vm323_vm2  ;;  %v1615_v8 = vld [vmem:[#allocation7 + $0x10] sm:$0xff]   ;;  %v2133_v10 = vld [vmem:[%s2095_s9 + $0x8] sm:$0xff]  ;;  %vm400_vm13 = vsmask.f32 7424  ;;  %vm562_vm14 = vcmask 1046528   ;;  %vm645_vm15 = vcmask 1040384  }
  0x8a   : > { %1396 = vmatprep.subr.bf16.mxu0 %v1850_v0  ;;  %1408 = vmatprep.subr.bf16.mxu1 %v1850_v0  ;;  %v2130_v9 = vld [vmem:[%s2095_s9] sm:$0xff]  ;;  %v320_v11 = vld [vmem:[#allocation2] sm:$0x1]  ;;  %v1616_v12 = vld [vmem:[#allocation7 + $0x38] sm:$0xff]   ;;  %vm329_vm8 = vcmp.gt.f32.partialorder %v2133_v10, 0.0  ;;  %s313_s26 = scalar_lea.vmem [#allocation12], %s1273_s19 }
  0x8b   : > { %v321_v13 = vsel %vm2118_vm4, 0, %v320_v11  ;;  %v325_v14 = vld [vmem:[#allocation2 + $0x8] sm:$0x1]  ;;  %vm328_vm7 = vcmp.gt.f32.partialorder %v2130_v9, 0.0  ;;  %v1617_v15 = vld [vmem:[#allocation7 + $0x18] sm:$0xff]   ;;  %vm2150_vm10 = vmor %vm318_vm1, %vm340_vm6  ;;  %vm686_vm6 = vcmask 1043456  }
  0x8c   : > { %322 = vst [vmem:[#allocation2] sm:$0x1] %v321_v13  ;;  %v326_v16 = vsel %vm2123_vm5, 0, %v325_v14  ;;  %v330_v17 = vmul.f32 0.2, %v2130_v9  ;;  %vm363_vm11 = vmand %vm362_vm9, %vm323_vm2  ;;  %v1620_v49 = vld [vmem:[#allocation7 + $0x40] sm:$0xff]  }
  0x8d   : > { %1397 = vmatpush3.bf16.msra.mxu0 %v1612_v3  ;;  %1409 = vmatpush3.bf16.msra.mxu1 %v1613_v4  ;;  %v331_v18 = vmul.f32 0.2, %v2133_v10  ;;  %327 = vst [vmem:[#allocation2 + $0x8] sm:$0x1] %v326_v16  ;;  %v1621_v51 = vld [vmem:[#allocation7 + $0x48] sm:$0xff]   ;;  %v1622_v53 = vld [vmem:[#allocation7 + $0x50] sm:$0xff]   ;;  %vm2180_vm3 = vmand %vm645_vm15, %vm318_vm1 }
  0x8e   : > { %1398 = vmatprep.subr.bf16.mxu0 %v1850_v0  ;;  %1410 = vmatprep.subr.bf16.mxu1 %v1850_v0  ;;  %v332_v19 = vsel %vm328_vm7, %v2130_v9, %v330_v17  ;;  %v1623_v55 = vld [vmem:[#allocation7 + $0x58] sm:$0xff]   ;;  %v1625_v59 = vld [vmem:[#allocation9] sm:$0xff]   ;;  %v1626_v60 = vld [vmem:[#allocation9 + $0x8] sm:$0xff]   ;;  %s1161_s30 = sshll.u32 %s313_s26, 4  ;;  %s1341_s13 = sshll.u32 %s1911_s25, 8  ;;  %s2229_s30 = int_to_ptr.vmem [resolvable:$true] %s1161_s30 }
  0x8f   : > { %v333_v20 = vsel %vm329_vm8, %v2133_v10, %v331_v18  ;;  %v1337_v21 = vpack.c.bf16 %v332_v19, %v332_v19  ;;  %v1627_v61 = vld [vmem:[#allocation9 + $0x40] sm:$0xff]   ;;  %v647_v62 = vld [vmem:[#allocation3] sm:$0x1]  ;;  %v1629_v3 = vld [vmem:[#allocation9 + $0x48] sm:$0xff]   ;;  %s2234_s12 = scalar_lea.hbm %s2284_s6, %s1341_s13  ;;  %s1148_s20 = scalar_lea.sflag [#allocation6], %s2089_s14 }
  0x90   : > { %v1338_v22 = vpack.c.bf16 %v333_v20, %v333_v20  ;;  %v1628_v1 = vld [vmem:[#allocation9 + $0x10] sm:$0xff]   ;;  %v648_v2 = vsel %vm2180_vm3, 0, %v647_v62  ;;  %v651_v4 = vld [vmem:[#allocation3 + $0x8] sm:$0x1]  ;;  %v1635_v13 = vld [vmem:[#allocation9 + $0x60] sm:$0xff]   ;;  %s1766_s19 = scalar_lea.vmem %s2229_s30, 256 }
  0x91   : > { %1399 = vmatpush3.bf16.msra.mxu0 %v1614_v7  ;;  %1411 = vmatpush3.bf16.msra.mxu1 %v1615_v8  ;;  %v343_v24 = vshrl.u32 %v1337_v21, 16  ;;  %v346_v25 = vshll.u32 %v1337_v21, 16  ;;  %649 = vst [vmem:[#allocation3] sm:$0x1] %v648_v2  ;;  %v1630_v5 = vld [vmem:[#allocation9 + $0x18] sm:$0xff]   ;;  %v1631_v7 = vld [vmem:[#allocation9 + $0x50] sm:$0xff]   ;;  %vm687_vm7 = vmand %vm686_vm6, %vm323_vm2  ;;  %p1767_p10 = scmp.ne.s32.totalorder %s2229_s30, %s1766_s19 }
  0x92   : > { %1400 = vmatprep.subr.bf16.mxu0 %v1850_v0  ;;  %1412 = vmatprep.subr.bf16.mxu1 %v1850_v0  ;;  %v351_v26 = vshrl.u32 %v1338_v22, 16  ;;  %v354_v27 = vshll.u32 %v1338_v22, 16  ;;  %v1632_v8 = vld [vmem:[#allocation9 + $0x20] sm:$0xff]   ;;  %v1633_v11 = vld [vmem:[#allocation9 + $0x58] sm:$0xff]   ;;  %v1636_v14 = vld [vmem:[#allocation9 + $0x30] sm:$0xff]   ;;  %s1852_s25 = smov [#allocation12]  }
  0x93   : > { %v345_v28 = vrot.slane %v343_v24, 7  ;;  %v364_v30 = vld [vmem:[#allocation2] sm:$0xf]  ;;  %v1638_v16 = vld [vmem:[#allocation9 + $0x38] sm:$0xff]   ;;  %v1639_v17 = vld [vmem:[#allocation9 + $0x70] sm:$0xff]   ;;  %p1768_p3 = pnand %p1767_p10, %p2038_p5  ;;  %s1770_s7 = sshll.u32 %s1852_s25, 4  ;;  %s1771_s7 = int_to_ptr.vmem [resolvable:$false] %s1770_s7 }
  0x94   : > { %v353_v29 = vrot.slane %v351_v26, 7  ;;  %v369_v31 = vld [vmem:[#allocation2 + $0x8] sm:$0x1]  ;;  %v1641_v18 = vld [vmem:[#allocation9 + $0x78] sm:$0xff]   ;;  %v1056_v19 = vld [vmem:[#allocation10] sm:$0xff]  ;;  %s1772_s9 = scalar_lea.vmem %s1771_s7, 512  ;;  %p1773_p12 = scmp.lt.s32.totalorder %s2229_s30, %s1771_s7 }
  0x95   : > { %1401 = vmatpush3.bf16.msra.mxu0 %v1616_v12  ;;  %1413 = vmatpush3.bf16.msra.mxu1 %v1617_v15  ;;  %v348_v32 = vor.u32 %v346_v25, %v345_v28  ;;  %v349_v33 = vrot.slane %v345_v28, 4  ;;  %v1634_v12 = vld [vmem:[#allocation9 + $0x28] sm:$0xff]   ;;  %v1059_v2 = vld [vmem:[#allocation10 + $0x18] sm:$0xff]  ;;  %p1769_p7 = pneg %p1768_p3  ;;  %p1774_p2 = scmp.lt.s32.totalorder %s1772_s9, %s1766_s19 }
  0x96   : > { %1418 = vmatprep.subr.bf16.mxu0 %v1850_v0  ;;  %1430 = vmatprep.subr.bf16.mxu1 %v1850_v0  ;;  %v356_v34 = vor.u32 %v354_v27, %v353_v29  ;;  %v358_v35 = vrot.slane %v353_v29, 4  ;;  %v1637_v15 = vld [vmem:[#allocation9 + $0x68] sm:$0xff]  }
  0x97   : > { %v365_v37 = vsel %vm363_vm11, %v348_v32, %v364_v30  ;;  %v1057_v20 = vld [vmem:[#allocation10 + $0x8] sm:$0xff]  ;;  %p1775_p1 = por %p1774_p2, %p1773_p12 }
  0x98   : > { %v357_v36 = vsel %vm2150_vm10, %v349_v33, %v356_v34  ;;  %v370_v38 = vsel %vm2118_vm4, %v358_v35, %v369_v31  ;;  %366 = vst [vmem:[#allocation2] sm:$0xf] %v365_v37  ;;  %vm650_vm4 = vmand %vm645_vm15, %vm323_vm2  ;;  %v1509_v21 = vpack.c.bf16 %v1057_v20, %v1056_v19  ;;  %v1298_v34 = vld [vmem:[%s2280_s2] ss:$0 sm:$0xff]  ;;  %v1643_v19 = vld [vmem:[#allocation9 + $0x80] sm:$0xff]  }
  0x99   : > { %368 = vst.msk [vmem:[#allocation2 + $0x4] sm:$0xf] %vm362_vm9, %v357_v36  ;;  %371 = vst [vmem:[#allocation2 + $0x8] sm:$0x1] %v370_v38  ;;  %v652_v6 = vsel %vm650_vm4, 0, %v651_v4  ;;  %p1776_p4 = pnand %p1775_p1, %p1769_p7 }
  0x9a   : > { %653 = vst [vmem:[#allocation3 + $0x8] sm:$0x1] %v652_v6 }
  0x9f   : > { %v372_v39 = vld [vmem:[#allocation2] sm:$0xf] }
  0xa0   : > { %v373_v40 = vld [vmem:[#allocation2 + $0x4] sm:$0xf]  ;;  %v1619_v42 = vld [vmem:[#allocation2 + $0x8] ss:$0 sps:$4 sm:$0x11]  }
  0xa1   : > { %v1280_v41 = vcombine.low %v372_v39, %v373_v40  ;;  %v409_v45 = vshll.u32 %v1619_v42, 16  ;;  %v549_v52 = vld [vmem:[#allocation2] sm:$0xe]  ;;  %v564_v57 = vrot.slane %v1619_v42, 1 }
  0xa2   : > { %v1292_v54 = vcombine.low %v549_v52, %v373_v40  ;;  %v688_v52 = vld [vmem:[#allocation3] sm:$0xf] }
  0xa3   : > { %v402_v43 = vshrl.u32 %v1280_v41, 16  ;;  %v404_v44 = vshll.u32 %v1280_v41, 16  ;;  %1415 = vmatmul.mubr.msk.bf16.vlgmr.msra.gmra.mrb[0].mxu1 %vm437_vm12, %v1280_v41  ;;  %v411_v47 = vrot.slane %v409_v45, 1 }
  0xa4   : > { %1446 = vmatprep.mubr.msk.bf16.mxu1 %vm1851_vm0, %v1850_v0  ;;  %v563_v56 = vrot.slane %v1292_v54, 1  ;;  %1431 = vmatpush3.bf16.msra.mxu1 %v1627_v61 }
  0xa5   : > { %v406_v46 = vrot.slane %v404_v44, 1  ;;  %1432 = vmatprep.subr.bf16.mxu1 %v1850_v0 }
  0xa6   : > { %v565_v58 = vsel %vm562_vm14, %v563_v56, %v564_v57  ;;  %v692_v56 = vld [vmem:[#allocation3 + $0x8] sm:$0x1] }
  0xa7   : > { %v407_v48 = vor.u32 %v406_v46, %v402_v43 }
  0xa8   : > { %1433 = vmatpush3.bf16.msra.mxu1 %v1629_v3 }
  0xa9   : > { %v412_v50 = vsel %vm400_vm13, %v407_v48, %v411_v47  ;;  %1434 = vmatprep.subr.bf16.mxu1 %v1850_v0 }
  0xaa   : > { %1403 = vmatmul.mubr.msk.bf16.vlgmr.msra.gmra.mrb[0].mxu0 %vm437_vm12, %v412_v50 }
  0xab   : > { %1419 = vmatpush3.bf16.msra.mxu0 %v1620_v49  ;;  %1426 = vmatprep.mubr.msk.bf16.mxu0 %vm1851_vm0, %v1850_v0 }
  0xac   : > { %1420 = vmatprep.subr.bf16.mxu0 %v1850_v0  ;;  %1435 = vmatpush3.bf16.msra.mxu1 %v1631_v7 }
  0xad   : > { %1436 = vmatprep.subr.bf16.mxu1 %v1850_v0 }
  0xaf   : > { %1421 = vmatpush3.bf16.msra.mxu0 %v1621_v51 }
  0xb0   : > { %1422 = vmatprep.subr.bf16.mxu0 %v1850_v0  ;;  %1437 = vmatpush3.bf16.msra.mxu1 %v1633_v11  ;;  %v1061_v11 = vld [vmem:[#allocation10 + $0x28] sm:$0xff] }
  0xb1   : > { %1438 = vmatprep.subr.bf16.mxu1 %v1850_v0 }
  0xb3   : > { %1423 = vmatpush3.bf16.msra.mxu0 %v1622_v53 }
  0xb4   : > { %1424 = vmatprep.subr.bf16.mxu0 %v1850_v0  ;;  %1439 = vmatpush3.bf16.msra.mxu1 %v1635_v13 }
  0xb5   : > { %1440 = vmatprep.subr.bf16.mxu1 %v1850_v0 }
  0xb7   : > { %1425 = vmatpush3.bf16.msra.mxu0 %v1623_v55 }
  0xb8   : > { %1450 = vmatprep.subr.bf16.mxu0 %v1850_v0  ;;  %1441 = vmatpush3.bf16.msra.mxu1 %v1637_v15  ;;  %v1062_v15 = vld [vmem:[#allocation10 + $0x30] sm:$0xff] }
  0xb9   : > { %1442 = vmatprep.subr.bf16.mxu1 %v1850_v0 }
  0xba   : > { %1427 = vmatmul.mubr.msk.bf16.vlgmr.msra.gmra.mrb[4].mxu0 %vm437_vm12, %v565_v58 }
  0xbb   : > { %1466 = vmatprep.mubr.msk.bf16.mxu0 %vm1851_vm0, %v1850_v0  ;;  %1451 = vmatpush3.bf16.msra.mxu0 %v1625_v59 }
  0xbc   : > { %1452 = vmatprep.subr.bf16.mxu0 %v1850_v0  ;;  %1443 = vmatpush3.bf16.msra.mxu1 %v1639_v17 }
  0xbd   : > { %1444 = vmatprep.subr.bf16.mxu1 %v1850_v0 }
  0xbf   : > { %1453 = vmatpush3.bf16.msra.mxu0 %v1626_v60 }
  0xc0   : > { %1454 = vmatprep.subr.bf16.mxu0 %v1850_v0  ;;  %1445 = vmatpush3.bf16.msra.mxu1 %v1641_v18 }
  0xc1   : > { %1470 = vmatprep.subr.bf16.mxu1 %v1850_v0 }
  0xc3   : > { %1455 = vmatpush3.bf16.msra.mxu0 %v1628_v1  ;;  %v1058_v1 = vld [vmem:[#allocation10 + $0x10] sm:$0xff] }
  0xc4   : > { %1456 = vmatprep.subr.bf16.mxu0 %v1850_v0  ;;  %v1513_v7 = vpack.c.bf16 %v1059_v2, %v1058_v1 }
  0xc7   : > { %1457 = vmatpush3.bf16.msra.mxu0 %v1630_v5 }
  0xc8   : > { %1458 = vmatprep.subr.bf16.mxu0 %v1850_v0 }
  0xcb   : > { %1459 = vmatpush3.bf16.msra.mxu0 %v1632_v8  ;;  %v1060_v8 = vld [vmem:[#allocation10 + $0x20] sm:$0xff] }
  0xcc   : > { %1460 = vmatprep.subr.bf16.mxu0 %v1850_v0 }
  0xcf   : > { %1461 = vmatpush3.bf16.msra.mxu0 %v1634_v12 }
  0xd0   : > { %1462 = vmatprep.subr.bf16.mxu0 %v1850_v0 }
  0xd3   : > { %1463 = vmatpush3.bf16.msra.mxu0 %v1636_v14  ;;  %v1517_v14 = vpack.c.bf16 %v1061_v11, %v1060_v8 }
  0xd4   : > { %1464 = vmatprep.subr.bf16.mxu0 %v1850_v0 }
  0xd7   : > { %1465 = vmatpush3.bf16.msra.mxu0 %v1638_v16  ;;  %v1063_v16 = vld [vmem:[#allocation10 + $0x38] sm:$0xff] }
  0xd8   : > { %1510 = vmatprep.subr.bf16.mxu0 %v1509_v21 }
 0x176   : > { %v542_v22 = vpop.f32.mrb[0].mxu1 }
 0x177   : > { %v1416_v24 = vpop.f32.mrb[1].mxu1 }
 0x178   : > { %v545_v25 = vpop.f32.mrb[2].mxu1  ;;  %v1646_v24 = vld [vmem:[#allocation9 + $0x98] sm:$0xff]  }
 0x179   : > { %v1417_v26 = vpop.f32.mrb[3].mxu1 }
 0x17a   : > { %v1648_v26 = vld [vmem:[#allocation9 + $0xa8] sm:$0xff]  }
 0x17d   : > { %v475_v27 = vpop.f32.mrb[0].mxu0 }
 0x17e   : > { %v543_v28 = vadd.f32 %v542_v22, %v475_v27  ;;  %v1404_v29 = vpop.f32.mrb[1].mxu0  ;;  %v1521_v22 = vpack.c.bf16 %v1063_v16, %v1062_v15  ;;  %v1649_v27 = vld [vmem:[#allocation9 + $0xb0] sm:$0xff]  }
 0x17f   : > { %v478_v30 = vpop.f32.mrb[2].mxu0 }
 0x180   : > { %v546_v31 = vadd.f32 %v545_v25, %v478_v30  ;;  %v1405_v32 = vpop.f32.mrb[3].mxu0  ;;  %v1647_v25 = vld [vmem:[#allocation9 + $0xa0] sm:$0xff]   ;;  %v1650_v30 = vld [vmem:[#allocation9 + $0xb8] sm:$0xff]  }
 0x18d   : > { %v627_v33 = vpop.f32.mrb[4].mxu0 }
 0x18e   : > { %v634_v35 = vadd.f32 %v627_v33, %v543_v28  ;;  %v1428_v36 = vpop.f32.mrb[5].mxu0 }
 0x18f   : > { %v630_v37 = vpop.f32.mrb[6].mxu0 }
 0x190   : > { %v643_v38 = vadd.f32 %v1298_v34, %v634_v35  ;;  %v635_v39 = vadd.f32 %v630_v37, %v546_v31  ;;  %v1429_v40 = vpop.f32.mrb[7].mxu0 }
 0x192   : > { %vm654_vm1 = vcmp.gt.f32.partialorder %v643_v38, 0.0  ;;  %v656_v41 = vmul.f32 0.2, %v643_v38  ;;  %v644_v42 = vadd.f32 %v1298_v34, %v635_v39 }
 0x194   : > { %v658_v43 = vsel %vm654_vm1, %v643_v38, %v656_v41  ;;  %vm655_vm5 = vcmp.gt.f32.partialorder %v644_v42, 0.0  ;;  %v657_v44 = vmul.f32 0.2, %v644_v42 }
 0x195   : > { %v1339_v45 = vpack.c.bf16 %v658_v43, %v658_v43 }
 0x196   : > { %v659_v46 = vsel %vm655_vm5, %v644_v42, %v657_v44 }
 0x197   : > { %v667_v47 = vshrl.u32 %v1339_v45, 16  ;;  %v1340_v48 = vpack.c.bf16 %v659_v46, %v659_v46  ;;  %v670_v50 = vshll.u32 %v1339_v45, 16  ;;  %v1328_v45 = vld [vmem:[%s2282_s4] ss:$0 sm:$0xff] }
 0x199   : > { %v669_v49 = vrot.slane %v667_v47, 7  ;;  %v675_v51 = vshrl.u32 %v1340_v48, 16  ;;  %v678_v55 = vshll.u32 %v1340_v48, 16 }
 0x19b   : > { %v672_v53 = vor.u32 %v670_v50, %v669_v49  ;;  %v677_v54 = vrot.slane %v675_v51, 7  ;;  %v673_v57 = vrot.slane %v669_v49, 4 }
 0x19d   : > { %v689_v58 = vsel %vm687_vm7, %v672_v53, %v688_v52  ;;  %v680_v59 = vor.u32 %v678_v55, %v677_v54  ;;  %v682_v60 = vrot.slane %v677_v54, 4 }
 0x19e   : > { %690 = vst [vmem:[#allocation3] sm:$0xf] %v689_v58 }
 0x19f   : > { %v681_v61 = vsel %vm2150_vm10, %v673_v57, %v680_v59  ;;  %v693_v62 = vsel %vm2180_vm3, %v682_v60, %v692_v56 }
 0x1a0   : > { %691 = vst [vmem:[#allocation3 + $0x4] sm:$0xf] %v681_v61  ;;  %694 = vst [vmem:[#allocation3 + $0x8] sm:$0x1] %v693_v62 }
 0x1a5   : > { %v695_v3 = vld [vmem:[#allocation3] sm:$0xf] }
 0x1a6   : > { %v931_v28 = vld [vmem:[#allocation3] sm:$0xe] }
 0x1a7   : > { %v696_v4 = vld [vmem:[#allocation3 + $0x4] sm:$0xf]  ;;  %v1642_v6 = vld [vmem:[#allocation3 + $0x8] ss:$0 sps:$4 sm:$0x11]  }
 0x1a8   : > { %v1301_v5 = vcombine.low %v695_v3, %v696_v4  ;;  %v747_v13 = vshll.u32 %v1642_v6, 16  ;;  %v1319_v29 = vcombine.low %v931_v28, %v696_v4  ;;  %v953_v31 = vrot.slane %v1642_v6, 1 }
 0x1aa   : > { %1467 = vmatmul.mubr.bf16.vlgmr.msra.gmra.mrb[8].mxu0 %v1301_v5  ;;  %v742_v12 = vshll.u32 %v1301_v5, 16  ;;  %v740_v23 = vshrl.u32 %v1301_v5, 16  ;;  %v749_v18 = vrot.slane %v747_v13, 1 }
 0x1ab   : > { %1512 = vmatpush3.bf16.msra.mxu0 %v1509_v21  ;;  %1506 = vmatprep.mubr.msk.f32.mxu0 %vm437_vm12, %v2130_v9  ;;  %v1644_v21 = vld [vmem:[#allocation9 + $0x88] sm:$0xff]   ;;  %v1645_v9 = vld [vmem:[#allocation9 + $0x90] sm:$0xff]  }
 0x1ac   : > { %v744_v63 = vrot.slane %v742_v12, 1  ;;  %1514 = vmatprep.subr.bf16.mxu0 %v1513_v7 }
 0x1ae   : > { %v745_v17 = vor.u32 %v744_v63, %v740_v23 }
 0x1af   : > { %1516 = vmatpush3.bf16.msra.mxu0 %v1513_v7 }
 0x1b0   : > { %v750_v20 = vsel %vm400_vm13, %v745_v17, %v749_v18  ;;  %1518 = vmatprep.subr.bf16.mxu0 %v1517_v14 }
 0x1b1   : > { %1447 = vmatmul.mubr.bf16.vlgmr.msra.gmra.mrb[4].mxu1 %v750_v20 }
 0x1b2   : > { %1471 = vmatpush3.bf16.msra.mxu1 %v1643_v19  ;;  %1486 = vmatprep.mubr.msk.bf16.mxu1 %vm1851_vm0, %v1850_v0 }
 0x1b3   : > { %1472 = vmatprep.subr.bf16.mxu1 %v1850_v0  ;;  %1520 = vmatpush3.bf16.msra.mxu0 %v1517_v14 }
 0x1b4   : > { %1522 = vmatprep.subr.bf16.mxu0 %v1521_v22 }
 0x1b6   : > { %1473 = vmatpush3.bf16.msra.mxu1 %v1644_v21 }
 0x1b7   : > { %1474 = vmatprep.subr.bf16.mxu1 %v1850_v0  ;;  %1524 = vmatpush3.bf16.msra.mxu0 %v1521_v22 }
 0x1ba   : > { %1475 = vmatpush3.bf16.msra.mxu1 %v1645_v9  ;;  %1507 = vmatmul.mubr.msk.f32.vlgmr.msra.gmra.mrb[12].mxu0 %vm437_vm12, %v2133_v10  ;;  %v952_v10 = vrot.slane %v1319_v29, 1 }
 0x1bb   : > { %1476 = vmatprep.subr.bf16.mxu1 %v1850_v0 }
 0x1bc   : > { %v954_v32 = vsel %vm562_vm14, %v952_v10, %v953_v31 }
 0x1be   : > { %1477 = vmatpush3.bf16.msra.mxu1 %v1646_v24 }
 0x1bf   : > { %1478 = vmatprep.subr.bf16.mxu1 %v1850_v0 }
 0x1c2   : > { %1479 = vmatpush3.bf16.msra.mxu1 %v1647_v25 }
 0x1c3   : > { %1480 = vmatprep.subr.bf16.mxu1 %v1850_v0 }
 0x1c6   : > { %1481 = vmatpush3.bf16.msra.mxu1 %v1648_v26 }
 0x1c7   : > { %1482 = vmatprep.subr.bf16.mxu1 %v1850_v0 }
 0x1ca   : > { %1483 = vmatpush3.bf16.msra.mxu1 %v1649_v27 }
 0x1cb   : > { %1484 = vmatprep.subr.bf16.mxu1 %v1850_v0 }
 0x1ce   : > { %1485 = vmatpush3.bf16.msra.mxu1 %v1650_v30 }
 0x1d1   : > { %1487 = vmatmul.mubr.bf16.vlgmr.msra.gmra.mrb[8].mxu1 %v954_v32 }
 0x27d   : > { %v924_v33 = vpop.f32.mrb[8].mxu0 }
 0x27e   : > { %v1468_v34 = vpop.f32.mrb[9].mxu0 }
 0x27f   : > { %v927_v35 = vpop.f32.mrb[10].mxu0 }
 0x280   : > { %v1469_v36 = vpop.f32.mrb[11].mxu0 }
 0x284   : > { %v834_v37 = vpop.f32.mrb[4].mxu1 }
 0x285   : > { %v925_v38 = vadd.f32 %v924_v33, %v834_v37  ;;  %v1448_v39 = vpop.f32.mrb[5].mxu1 }
 0x286   : > { %v837_v40 = vpop.f32.mrb[6].mxu1 }
 0x287   : > { %v928_v41 = vadd.f32 %v927_v35, %v837_v40  ;;  %v1449_v42 = vpop.f32.mrb[7].mxu1 }
 0x28d   : > { %v1508_v43 = vpop.f32.mrb[12].mxu0 }
 0x28e   : > { %v1136_v0 = vpop.f32.mrb[13].mxu0 }
 0x2a4   : > { %v1038_v44 = vpop.f32.mrb[8].mxu1 }
 0x2a5   : > { %v1045_v46 = vadd.f32 %v1038_v44, %v925_v38  ;;  %v1488_v47 = vpop.f32.mrb[9].mxu1 }
 0x2a6   : > { %v1041_v48 = vpop.f32.mrb[10].mxu1 }
 0x2a7   : > { %v1046_v49 = vadd.f32 %v1041_v48, %v928_v41  ;;  %v1489_v50 = vpop.f32.mrb[11].mxu1  ;;  %v1054_v51 = vadd.f32 %v1328_v45, %v1045_v46 }
 0x2a9   : > { %v1055_v52 = vadd.f32 %v1328_v45, %v1046_v49  ;;  %v1137_v53 = vadd.f32 %v1136_v0, %v1054_v51 }
 0x2ab   : > { %v1142_v54 = vadd.f32 %v1508_v43, %v1055_v52  ;;  %1145 = vst [vmem:[%s313_s26] sm:$0xff] %v1137_v53 }
 0x2ad   : > { %1146 = vst [vmem:[%s313_s26 + $0x8] sm:$0xff] %v1142_v54 }
 0x2ae   : > { %1779 = shalt.err (!%p1776_p4)
}
 0x2af   : > { %s1780_s27 = scalar_lea.hbm %s2234_s12, 256  ;;  %s1784_s18 = scalar_lea.hbm %s2284_s6, 512 }
 0x2b0   : > { %p1781_p9 = scmp.ne.s32.totalorder %s2234_s12, %s1780_s27  ;;  %p1785_p8 = scmp.lt.u32.totalorder %s2234_s12, %s2284_s6 }
 0x2b1   : > { %p1786_p13 = scmp.lt.u32.totalorder %s1784_s18, %s1780_s27  ;;  %p1788_p10 = scmp.lt.u32.totalorder %s1780_s27, %s2234_s12 }
 0x2b2   : > { %p1782_p0 = pnand %p1781_p9, %p2038_p5 }
 0x2b3   : > { %p1787_p6 = por %p1786_p13, %p1785_p8 }
 0x2b4   : > { %p1783_p11 = pneg %p1782_p0 }
 0x2b5   : > { %p1789_p3 = por %p1788_p10, %p1787_p6 }
 0x2b7   : > { %p1790_p7 = pnand %p1789_p3, %p1783_p11 }
 0x2b9   : > { %1793 = shalt.err (!%p1790_p7)
}
 0x2ba   : > { %s1853_s16 = smov 128   ;;  %s1854_s17 = smov 8  }
 0x2bb   : > { %1539 = dma.vmem_to_hbm [thread:$0]  (%p2038_p5), %s2229_s30, 256, %s2234_s12, %s1148_s20, %s1853_s16, %s1853_s16, %s1854_s17  }
 0x2bc PF: > { %s1176_s19 = sand.u32 1, %s1828_s21   ;;  %p2310_p12 = scmp.ne.s32.totalorder %s2289_s28, 0 }
 0x2bd   : > { %p2311_p2 = scmp.ge.s32.totalorder %s1840_s24, 2  ;;  %s1177_s25 = scalar_lea.sflag [#allocation6], %s1176_s19 }
 0x2bf   : > { %p1556_p1 = pnand %p2311_p2, %p2310_p12 }
 0x2c1   : > { %1823 = dma.done.wait (!%p1556_p1), %s1177_s25, 256  }
 0x2c2   : > { %1825 = vsyncadd (!%p1556_p1), %s1177_s25, 4294967040  ;;  %p21_p4 = scmp.ge.s32.totalorder %s2024_s11, 4   ;;  %s2312_s21 = smov %s1832_s22 }
 0x2c3   : > { %s2313_s22 = smov %s1836_s23  ;;  %s2314_s23 = smov %s2034_s15 }
 0x2c4   : > { %s2315_s24 = smov %s2024_s11  ;;  %23 = sbr.rel (!%p21_p4) target bundleno = 7 (0x7), region = 105 }
 0x2cb   :  { %1182 = vsyncpa [#allocation5], 1 }
 0x2cc   :  { %1184 = vsyncpa [#allocation5 + $0x1], 1 }
 0x2cd   :  { %1185 = vsyncpa [#allocation8], 1 }
 0x2ce   :  { %1186 = vsyncpa [#allocation11], 1 }
 0x2cf   :  { %1187 = vsyncpa [#allocation6], 1 }
 0x2d0   :  { %1189 = vsyncpa [#allocation6 + $0x1], 1 }

</bundles_post_ra>
